<compile_context>
chip_gen: v6e
topology: v6e:2x2x1
jax: 0.10.0
libtpu: 0.0.40
codegen_flags: <defaults>
</compile_context>

<pallas_src>
import functools

import jax
import jax.numpy as jnp
import numpy as np
from jax.experimental import pallas as pl
from jax.experimental.pallas import tpu as pltpu


def _round_up(x, m):
    return (x + m - 1) // m * m


def _as_indep_kernel(x_ref, w_ref, b_ref, loc_ref, scale_ref, acc_ref):
    """Fused: acc (+)= x @ [w_loc | w_scale]; at the last k step fold the bias,
    split at the lane-aligned L boundary and apply (identity, softplus)."""
    k = pl.program_id(1)
    part = jnp.dot(x_ref[...], w_ref[...], preferred_element_type=jnp.float32)

    @pl.when(k == 0)
    def _():
        acc_ref[...] = part

    @pl.when(k > 0)
    def _():
        acc_ref[...] += part

    @pl.when(k == pl.num_programs(1) - 1)
    def _():
        L = loc_ref.shape[-1]                      # static; multiple of 128
        y = acc_ref[...] + b_ref[...]              # (TN, 2L) + (1, 2L) bcast
        loc_ref[...] = y[:, :L].astype(loc_ref.dtype)
        raw = y[:, L:]
        # numerically-stable softplus; for raw > 20 softplus(raw) == raw to
        # within ~2e-9 (matches torch.nn.functional.softplus threshold=20).
        # NOTE: like torch, softplus underflows to 0.0 for raw <~ -87.
        scale = jnp.where(raw > 20.0, raw,
                          jnp.log1p(jnp.exp(jnp.minimum(raw, 20.0))))
        scale_ref[...] = scale.astype(scale_ref.dtype)


@jax.jit
def _linear_split_softplus(x2d, w, b):
    """loc = x @ w[:, :L] + b[:, :L] ; scale = softplus(x @ w[:, L:] + b[:, L:]).
    x2d/w are bf16 (f32 accumulation); w/b have each L-half padded to Lp."""
    N, K = x2d.shape
    Kw, twoL = w.shape
    Lp = twoL // 2
    assert Kw == K and b.shape == (1, twoL) and Lp % 128 == 0

    # --- VMEM budget: ~75% of physical, so v7x's 64 MiB keeps headroom -------
    try:
        phys = pltpu.get_tpu_info().vmem_capacity_bytes
    except Exception:
        phys = 64 << 20                      # conservative (v7x physical)
    budget = int(phys * 0.75)

    xe, we, f32 = 2, 2, 4                    # bf16 streams, f32 acc/outputs

    def vmem_need(tn, tk):
        return (2 * tn * tk * xe             # x tiles (double buffered)
                + 2 * tk * twoL * we         # fused weight tile
                + 2 * twoL * f32             # bias
                + 2 * 2 * tn * Lp * f32      # loc / scale output tiles
                + tn * twoL * f32)           # accumulator

    # --- row tile: multiple of 16 (bf16 sublanes), up to 512; >= 2 tiles when
    #     possible so the "parallel" axis shards across v7x's two TensorCores.
    if N <= 16:
        TN = _round_up(N, 8)
    else:
        TN = min(512, _round_up(-(-N // 2), 16), _round_up(N, 16))

    # --- K tile: keep the fused weight grid-constant (TK == K, VMEM resident)
    #     whenever it fits; otherwise zero-pad K and stream 512-wide slabs.
    TK, Kp = K, K
    if vmem_need(TN, TK) > budget:
        TK = 512
        while vmem_need(TN, TK) > budget and TN > 16:
            TN = max(16, _round_up(TN // 2, 16))
        while vmem_need(TN, TK) > budget and TK > 128:
            TK //= 2
        Kp = _round_up(K, TK)
        if Kp != K:                          # zero-pad: exact for the reduction
            x2d = jnp.pad(x2d, ((0, 0), (0, Kp - K)))
            w = jnp.pad(w, ((0, Kp - K), (0, 0)))
    # TODO(synk): for very large latent (Lp >= ~2K on v7x) add a third,
    # "parallel" L grid axis instead of shrinking TN.

    grid = (pl.cdiv(N, TN), Kp // TK)
    w_passes = 1 if TK == Kp else grid[0]    # weights re-streamed per row tile
    cost = pl.CostEstimate(
        flops=2 * N * Kp * twoL,                           # one fused matmul
        transcendentals=2 * N * Lp,                        # exp + log1p
        bytes_accessed=(N * Kp * xe + w_passes * Kp * twoL * we
                        + twoL * f32 + 2 * N * Lp * f32),
    )
    vmem_limit = min(budget, max(16 << 20, 2 * vmem_need(TN, TK)))

    return pl.pallas_call(
        _as_indep_kernel,
        out_shape=(
            jax.ShapeDtypeStruct((N, Lp), jnp.float32),
            jax.ShapeDtypeStruct((N, Lp), jnp.float32),
        ),
        grid=grid,
        in_specs=[
            pl.BlockSpec((TN, TK), lambda i, k: (i, k)),    # x (bf16)
            pl.BlockSpec((TK, twoL), lambda i, k: (k, 0)),  # [w_loc|w_scale]
            pl.BlockSpec((1, twoL), lambda i, k: (0, 0)),   # [b_loc|b_scale]
        ],
        out_specs=(
            pl.BlockSpec((TN, Lp), lambda i, k: (i, 0)),    # loc
            pl.BlockSpec((TN, Lp), lambda i, k: (i, 0)),    # scale
        ),
        scratch_shapes=[pltpu.VMEM((TN, twoL), jnp.float32)],
        compiler_params=pltpu.CompilerParams(
            dimension_semantics=("parallel", "arbitrary"),
            vmem_limit_bytes=vmem_limit,
        ),
        cost_estimate=cost,
    )(x2d, w, b)


class AsIndependentNormal:
    """JAX/Pallas port of AsIndependentDistribution wrapping Linear(K -> 2L)
    with transforms = (identity, softplus): returns (loc, scale), the
    parameters of Independent(Normal(loc, scale), n_dim_out)."""

    def __init__(self, in_features, latent, *, n_dim_in=1, n_dim_out=1, key=None):
        assert n_dim_in >= 1 and n_dim_out >= 1
        self.n_dim_in, self.n_dim_out = n_dim_in, n_dim_out
        self.in_features, self.latent = in_features, latent
        key = jax.random.PRNGKey(42) if key is None else key
        kw, kb = jax.random.split(key)
        bound = 1.0 / np.sqrt(in_features)           # torch.nn.Linear default
        # master copies in f32, stored transposed vs torch: (K, 2L)
        self.w = jax.random.uniform(
            kw, (in_features, 2 * latent), jnp.float32, -bound, bound)
        self.b = jax.random.uniform(
            kb, (1, 2 * latent), jnp.float32, -bound, bound)
        # kernel copies: pad each L-half up to a multiple of 128 so the
        # loc/scale split is lane-tile aligned and stores stay lane dense;
        # streamed operands stored in bf16 (f32 accumulation in-kernel).
        Lp = _round_up(latent, 128)
        wk = jnp.zeros((in_features, 2 * Lp), jnp.float32)
        wk = wk.at[:, :latent].set(self.w[:, :latent])
        wk = wk.at[:, Lp:Lp + latent].set(self.w[:, latent:])
        bk = jnp.zeros((1, 2 * Lp), jnp.float32)
        bk = bk.at[:, :latent].set(self.b[:, :latent])
        bk = bk.at[:, Lp:Lp + latent].set(self.b[:, latent:])
        self.Lp = Lp
        self.w_k = wk.astype(jnp.bfloat16)
        self.b_k = bk                                  # bias stays f32

    def __call__(self, x):
        # flatten all leading dims except the trailing n_dim_in feature dims
        at = x.ndim - self.n_dim_in
        lead = x.shape[:at]
        x2d = x.reshape((-1, int(np.prod(x.shape[at:])))).astype(jnp.bfloat16)
        loc, scale = _linear_split_softplus(x2d, self.w_k, self.b_k)
        loc = loc[:, :self.latent].reshape(lead + (self.latent,))
        scale = scale[:, :self.latent].reshape(lead + (self.latent,))
        # TODO(synk): torch.distributions.Independent(Normal(loc, scale), 1)
        # has no JAX-array equivalent here; return its parameters instead.
        return loc, scale


def _reference(x, w, b, latent):
    x2d = x.reshape((-1, x.shape[-1]))
    y = x2d @ w + b
    y = y.reshape(x.shape[:-1] + (2 * latent,))
    loc, raw = y[..., :latent], y[..., latent:]
    return loc, jnp.logaddexp(raw, 0.0)


if __name__ == "__main__":
    T, B, K, L = 4, 8, 128, 128   # N = 32 rows -> two 16-row tiles
    x = jax.random.normal(jax.random.PRNGKey(0), (T, B, K), jnp.float32)

    mod = AsIndependentNormal(K, L, key=jax.random.PRNGKey(42))
    loc, scale = jax.block_until_ready(mod(x))

    ref_loc, ref_scale = _reference(x, mod.w, mod.b, L)
    assert loc.shape == (T, B, L) and scale.shape == (T, B, L)
    # bf16 storage of x / w => compare against the f32 reference at ~1e-2.
    np.testing.assert_allclose(np.asarray(loc), np.asarray(ref_loc),
                               rtol=2e-2, atol=2e-2)
    np.testing.assert_allclose(np.asarray(scale), np.asarray(ref_scale),
                               rtol=2e-2, atol=2e-2)
    assert bool(jnp.all(scale > 0))
    print("KERNEL_OK")
</pallas_src>

<mosaic_0001>
module attributes {stable_mosaic.version = 11 : i64} {
  func.func @_as_indep_kernel(%arg0: i32, %arg1: i32, %arg2: memref<16x128xbf16, #tpu.memory_space<vmem>>, %arg3: memref<128x256xbf16, #tpu.memory_space<vmem>>, %arg4: memref<1x256xf32, #tpu.memory_space<vmem>>, %arg5: memref<16x128xf32, #tpu.memory_space<vmem>>, %arg6: memref<16x128xf32, #tpu.memory_space<vmem>>, %arg7: memref<16x256xf32, #tpu.memory_space<vmem>>) attributes {dimension_semantics = [#tpu.dimension_semantics<parallel>, #tpu.dimension_semantics<arbitrary>], iteration_bounds = array<i64: 2, 1>, scalar_prefetch = 0 : i64, scratch_operands = 1 : i64, tpu.core_type = #tpu.core_type<tc>, window_params = [{transform_indices = @transform_0, window_bounds = array<i64: 16, 128>}, {transform_indices = @transform_1, window_bounds = array<i64: 128, 256>}, {pipeline_mode = #tpu.pipeline_mode<synchronous>, transform_indices = @transform_2, window_bounds = array<i64: 1, 256>}, {transform_indices = @transform_3, window_bounds = array<i64: 16, 128>}, {transform_indices = @transform_4, window_bounds = array<i64: 16, 128>}]} {
    %c0 = arith.constant 0 : index
    %c0_0 = arith.constant 0 : index
    %0 = vector.load %arg2[%c0, %c0_0] : memref<16x128xbf16, #tpu.memory_space<vmem>>, vector<16x128xbf16>
    %c0_1 = arith.constant 0 : index
    %c0_2 = arith.constant 0 : index
    %1 = vector.load %arg3[%c0_1, %c0_2] : memref<128x256xbf16, #tpu.memory_space<vmem>>, vector<128x256xbf16>
    %cst = arith.constant dense<0.000000e+00> : vector<16x256xf32>
    %2 = tpu.matmul %0, %1, %cst {dimension_numbers = #tpu.dot_dimension_numbers<[1], [0], [0], [1], [0, 0, 1, 1], [], []>} : vector<16x128xbf16>, vector<128x256xbf16>, vector<16x256xf32> -> vector<16x256xf32>
    %c0_i32 = arith.constant 0 : i32
    %3 = arith.cmpi eq, %arg1, %c0_i32 : i32
    %4 = arith.extui %3 : i1 to i32
    %c0_i32_3 = arith.constant 0 : i32
    %5 = arith.cmpi ne, %4, %c0_i32_3 : i32
    scf.if %5 {
      %c0_8 = arith.constant 0 : index
      %c0_9 = arith.constant 0 : index
      %12 = vector.load %arg7[%c0_8, %c0_9] : memref<16x256xf32, #tpu.memory_space<vmem>>, vector<16x256xf32>
      tpu.vector_store %arg7[%c0_8, %c0_9], %2 {strides = array<i32>} : memref<16x256xf32, #tpu.memory_space<vmem>>, vector<16x256xf32>,
    } else {
    }
    %c0_i32_4 = arith.constant 0 : i32
    %6 = arith.cmpi sgt, %arg1, %c0_i32_4 : i32
    %7 = arith.extui %6 : i1 to i32
    %c0_i32_5 = arith.constant 0 : i32
    %8 = arith.cmpi ne, %7, %c0_i32_5 : i32
    scf.if %8 {
      %c0_8 = arith.constant 0 : index
      %c0_9 = arith.constant 0 : index
      %12 = vector.load %arg7[%c0_8, %c0_9] : memref<16x256xf32, #tpu.memory_space<vmem>>, vector<16x256xf32>
      %13 = arith.addf %12, %2 : vector<16x256xf32>
      %c0_10 = arith.constant 0 : index
      %c0_11 = arith.constant 0 : index
      %14 = vector.load %arg7[%c0_10, %c0_11] : memref<16x256xf32, #tpu.memory_space<vmem>>, vector<16x256xf32>
      tpu.vector_store %arg7[%c0_10, %c0_11], %13 {strides = array<i32>} : memref<16x256xf32, #tpu.memory_space<vmem>>, vector<16x256xf32>,
    } else {
    }
    %c0_i32_6 = arith.constant 0 : i32
    %9 = arith.cmpi eq, %arg1, %c0_i32_6 : i32
    %10 = arith.extui %9 : i1 to i32
    %c0_i32_7 = arith.constant 0 : i32
    %11 = arith.cmpi ne, %10, %c0_i32_7 : i32
    scf.if %11 {
      %c0_8 = arith.constant 0 : index
      %c0_9 = arith.constant 0 : index
      %12 = vector.load %arg7[%c0_8, %c0_9] : memref<16x256xf32, #tpu.memory_space<vmem>>, vector<16x256xf32>
      %c0_10 = arith.constant 0 : index
      %c0_11 = arith.constant 0 : index
      %13 = vector.load %arg4[%c0_10, %c0_11] : memref<1x256xf32, #tpu.memory_space<vmem>>, vector<1x256xf32>
      %14 = vector.broadcast %13 : vector<1x256xf32> to vector<16x256xf32>
      %15 = arith.addf %12, %14 : vector<16x256xf32>
      %16 = vector.extract_strided_slice %15 {offsets = [0, 0], sizes = [16, 128], strides = [1, 1]} : vector<16x256xf32> to vector<16x128xf32>
      %c0_12 = arith.constant 0 : index
      %c0_13 = arith.constant 0 : index
      %17 = vector.load %arg5[%c0_12, %c0_13] : memref<16x128xf32, #tpu.memory_space<vmem>>, vector<16x128xf32>
      tpu.vector_store %arg5[%c0_12, %c0_13], %16 {strides = array<i32>} : memref<16x128xf32, #tpu.memory_space<vmem>>, vector<16x128xf32>,
      %18 = vector.extract_strided_slice %15 {offsets = [0, 128], sizes = [16, 128], strides = [1, 1]} : vector<16x256xf32> to vector<16x128xf32>
      %cst_14 = arith.constant 2.000000e+01 : f32
      %19 = vector.broadcast %cst_14 : f32 to vector<16x128xf32>
      %20 = arith.cmpf ogt, %18, %19 : vector<16x128xf32>
      %cst_15 = arith.constant 2.000000e+01 : f32
      %21 = vector.broadcast %cst_15 : f32 to vector<16x128xf32>
      %22 = arith.minimumf %18, %21 : vector<16x128xf32>
      %23 = math.exp %22 : vector<16x128xf32>
      %24 = math.log1p %23 : vector<16x128xf32>
      %25 = arith.select %20, %18, %24 : vector<16x128xi1>, vector<16x128xf32>
      %c0_16 = arith.constant 0 : index
      %c0_17 = arith.constant 0 : index
      %26 = vector.load %arg6[%c0_16, %c0_17] : memref<16x128xf32, #tpu.memory_space<vmem>>, vector<16x128xf32>
      tpu.vector_store %arg6[%c0_16, %c0_17], %25 {strides = array<i32>} : memref<16x128xf32, #tpu.memory_space<vmem>>, vector<16x128xf32>,
    } else {
    }
    return
  }
  func.func @transform_0(%arg0: i32, %arg1: i32) -> (i32, i32) {
    %c0_i32 = arith.constant 0 : i32
    return %arg0, %arg1 : i32, i32
  }
  func.func @transform_1(%arg0: i32, %arg1: i32) -> (i32, i32) {
    %c0_i32 = arith.constant 0 : i32
    %c0_i32_0 = arith.constant 0 : i32
    return %arg1, %c0_i32 : i32, i32
  }
  func.func @transform_2(%arg0: i32, %arg1: i32) -> (i32, i32) {
    %c0_i32 = arith.constant 0 : i32
    %c0_i32_0 = arith.constant 0 : i32
    %c0_i32_1 = arith.constant 0 : i32
    return %c0_i32, %c0_i32_0 : i32, i32
  }
  func.func @transform_3(%arg0: i32, %arg1: i32) -> (i32, i32) {
    %c0_i32 = arith.constant 0 : i32
    %c0_i32_0 = arith.constant 0 : i32
    return %arg0, %c0_i32 : i32, i32
  }
  func.func @transform_4(%arg0: i32, %arg1: i32) -> (i32, i32) {
    %c0_i32 = arith.constant 0 : i32
    %c0_i32_0 = arith.constant 0 : i32
    return %arg0, %c0_i32 : i32, i32
  }
}

</mosaic_0001>

<bundles_post_ra>
// kernel: _linear_split_softplus.1
= control target key start
LH: loop header
LB: loop body
LE: loop exit
PB: predicated region body
PF: predicated region fallthrough
CT: control target
= control target key end

     0   :  { %s1259_s0 = inlined_call_operand.hbm [shape: bf16[32,128], index: 0, kind: input, shape index: {}]   ;;  %s1260_s1 = inlined_call_operand.hbm [shape: bf16[128,256], index: 1, kind: input, shape index: {}]   ;;  %s1261_s2 = inlined_call_operand.vmem [shape: f32[1,256], index: 2, kind: input, shape index: {}]   ;;  %s1262_s3 = inlined_call_operand.hbm [shape: f32[32,128], index: 3, kind: output, shape index: {0}]   ;;  %s1263_s4 = inlined_call_operand.hbm [shape: f32[32,128], index: 4, kind: output, shape index: {1}]  }
   0x1   :  { %1265 = sst [smem:[#allocation15_spill]] %s1260_s1 }
   0x2   :  { %10 = vsyncpa [#allocation4], 0 }
   0x3   :  { %12 = vsyncpa [#allocation4 + $0x1], 0 }
   0x4   :  { %13 = vsyncpa [#allocation7], 0 }
   0x5   :  { %14 = vsyncpa [#allocation5], 0 }
   0x6   :  { %16 = vsyncpa [#allocation5 + $0x1], 0 }
   0x7   :  { %17 = vsyncpa [#allocation10], 0 }
   0x8   :  { %19 = vsyncpa [#allocation10 + $0x1], 0  ;;  %s1024_s15 = smov 0   ;;  %s1026_s16 = smov 0  }
   0x9   :  { %s1028_s17 = smov 0   ;;  %s1030_s18 = smov 0  }
   0xa   :  { %s1032_s19 = smov 0   ;;  %s1034_s20 = smov 0  }
   0xb LB: > { %s659_s21 = sadd.s32 4294967295, %s986_s20   ;;  %s660_s22 = sadd.s32 4294967294, %s986_s20   ;;  %s986_s20 = sphi %s1034_s20, %s25_s20   ;;  %s982_s19 = sphi %s1032_s19, %s1283_s19   ;;  %s978_s18 = sphi %s1030_s18, %s1282_s18   ;;  %s974_s17 = sphi %s1028_s17, %s1281_s17   ;;  %s970_s16 = sphi %s1026_s16, %s1280_s16   ;;  %s966_s15 = sphi %s1024_s15, %s1279_s15  }
   0xc   : > { %p59_p0 = scmp.ne.s32.totalorder %s970_s16, %s966_s15  ;;  %p1058_p1 = scmp.eq.s32.totalorder %s659_s21, 0 }
   0xd   : > { %p1062_p2 = scmp.eq.s32.totalorder %s659_s21, 1  ;;  %p136_p3 = scmp.eq.s32.totalorder %s660_s22, 1 }
   0xe   : > { %p1068_p4 = por %p1058_p1, %p59_p0  ;;  %p661_p5 = scmp.ge.s32.totalorder %s986_s20, 1 }
   0xf   : > { %p1073_p6 = por %p136_p3, %p59_p0  ;;  %p169_p7 = scmp.lt.s32.totalorder %s986_s20, 3 }
  0x10   : > { %s1268_s25 = scalar_select %p1068_p4, 1, 0 }
  0x11   : > { %s1269_s26 = scalar_select %p1073_p6, 1, 0 }
  0x12   : > { %p1078_p8 = pnand %p661_p5, %p169_p7  ;;  %s988_s28 = smov [#allocation6]  }
  0x13   : > { %s185_s29 = sshll.u32 %s988_s28, 4  ;;  %s37_s5 = sadd.s32 1, %s982_s19  ;;  %s186_s29 = int_to_ptr.vmem [resolvable:$true] %s185_s29 }
  0x14   : > { %p710_p9 = pneg %p1078_p8  ;;  %s829_s6 = scalar_lea.vmem %s186_s29, 2048 }
  0x15   : > { %p830_p13 = scmp.ne.s32.totalorder %s186_s29, %s829_s6  ;;  %p837_p5 = scmp.lt.s32.totalorder %s186_s29, %s186_s29 }
  0x16   : > { %p1087_p11 = pnand %p710_p9, %p1058_p1  ;;  %p838_p7 = scmp.lt.s32.totalorder %s829_s6, %s829_s6 }
  0x18   : > { %p820_p12 = pneg %p1087_p11  ;;  %p839_p6 = por %p838_p7, %p837_p5 }
  0x1a   : > { %p832_p0 = pnand %p830_p13, %p820_p12 }
  0x1c   : > { %p833_p3 = pneg %p832_p0 }
  0x1e   : > { %p840_p4 = pnand %p839_p6, %p833_p3 }
  0x20   : > { %843 = shalt.err (!%p840_p4)
}
  0x21   : > { %s989_s7 = smov 128   ;;  %s990_s8 = smov 8  }
  0x22   : > { %s1272_s1 = sld [smem:[#allocation15_spill]]  ;;  %p39_p6 = scmp.ge.s32.totalorder %s37_s5, 2 }
  0x23   : > { %s46_s11 = sadd.s32 1, %s974_s17  ;;  %p53_p4 = scmp.ne.s32.totalorder %s974_s17, %s970_s16 }
  0x24   : > { %p54_p9 = scmp.eq.s32.totalorder %s986_s20, 0  ;;  %s1285_s5 = smov (%p39_p6, %s37_s5), 0 }
  0x25   : > { %p1111_p13 = por %p1062_p2, %p53_p4  ;;  %s41_s14 = ssub.s32 %s982_s19, %s1285_s5 }
  0x26   : > { %p1105_p12 = por %p54_p9, %p53_p4  ;;  %p726_p0 = scmp.lt.s32.totalorder %s986_s20, 2 }
  0x27   : > { %s202_s21 = sand.u32 1, %s974_s17  }
  0x28   : > { %713 = dma.hbm_to_vmem [thread:$0]  (!%p1087_p11), %s1272_s1, 2048, %s186_s29, [#allocation7], %s989_s7, %s989_s7, %s990_s8  }
  0x29   : > { %p44_p11 = scmp.eq.s32.totalorder %s41_s14, 0  ;;  %s664_s22 = sshll.u32 %s202_s21, 3 }
  0x2a   : > { %s697_s29 = sshll.u32 %s982_s19, 7  ;;  %s206_s8 = scalar_lea.vmem [#allocation3], %s664_s22 }
  0x2b   : > { %s1120_s28 = scalar_select %p44_p11, %s974_s17, %s46_s11  }
  0x2c   : > { %s213_s7 = scalar_lea.hbm %s1259_s0, %s697_s29  ;;  %s214_s9 = sshll.u32 %s206_s8, 4  ;;  %s215_s9 = int_to_ptr.vmem [resolvable:$true] %s214_s9 }
  0x2d   : > { %p1128_p2 = pnand %p726_p0, %p1105_p12  ;;  %s203_s10 = scalar_lea.sflag [#allocation4], %s202_s21 }
  0x2e   : > { %s857_s14 = scalar_lea.vmem %s215_s9, 128  ;;  %s991_s11 = smov [#allocation3]  }
  0x2f   : > { %p846_p3 = pneg %p1128_p2  ;;  %p858_p5 = scmp.ne.s32.totalorder %s215_s9, %s857_s14 }
  0x30   : > { %s862_s1 = sshll.u32 %s991_s11, 4  ;;  %s863_s1 = int_to_ptr.vmem [resolvable:$false] %s862_s1 }
  0x31   : > { %p860_p7 = pnand %p858_p5, %p846_p3  ;;  %s864_s29 = scalar_lea.vmem %s863_s1, 256 }
  0x32   : > { %p865_p4 = scmp.lt.s32.totalorder %s215_s9, %s863_s1  ;;  %p866_p9 = scmp.lt.s32.totalorder %s864_s29, %s857_s14 }
  0x33   : > { %p861_p6 = pneg %p860_p7 }
  0x34   : > { %p867_p11 = por %p866_p9, %p865_p4 }
  0x36   : > { %p868_p10 = pnand %p867_p11, %p861_p6 }
  0x38   : > { %871 = shalt.err (!%p868_p10)
}
  0x39   : > { %s992_s12 = smov 64   ;;  %s993_s22 = smov 4  }
  0x3a   : > { %717 = dma.hbm_to_vmem [thread:$0]  (!%p1128_p2), %s213_s7, 128, %s215_s9, %s203_s10, %s992_s12, %s992_s12, %s993_s22  }
  0x3b   : > { %226 = sbr.rel (%p1078_p8) target bundleno = 362 (0x16a), region = 32  ;;  %s1139_s21 = sand.u32 (!%p1078_p8), 1, %s970_s16  }
  0x3c   : > { %s668_s30 = sshll.u32 (!%p1078_p8), %s1139_s21, 3  ;;  %s229_s1 = scalar_lea.sflag (!%p1078_p8), [#allocation4], %s1139_s21 }
  0x3d   : > { %s1143_s6 = scalar_lea.vmem (!%p1078_p8), [#allocation3], %s668_s30  ;;  %p1276_p12 = scmp.ne.s32.totalorder (!%p1078_p8), %s1268_s25, 0 }
  0x40   : > { %949 = dma.done.wait (%p1276_p12), %s229_s1, 128  }
  0x41   : > { %951 = vsyncadd (%p1276_p12), %s229_s1, 4294967168 }
  0x42   : > { %953 = dma.done.wait (%p1058_p1), [#allocation7], 2048  }
  0x43   : > { %955 = vsyncadd (%p1058_p1), [#allocation7], 4294965248  ;;  %v994_v0 = vmov 0   ;;  %v785_v1 = vld [vmem:[#allocation6 + $0x74] ss:$8 sps:$4 sm:$0xff]   ;;  %v451_v18 = vlaneseq  ;;  %s670_s27 = sshll.u32 %s1139_s21, 4 }
  0x44   : > { %407 = vmatprep.mubr.bf16.mxu0 %v994_v0  ;;  %v787_v2 = vld [vmem:[#allocation6 + $0x70] ss:$8 sps:$4 sm:$0xff]   ;;  %375 = vmatprep.subr.bf16.mxu0 %v785_v1  ;;  %v788_v3 = vld [vmem:[#allocation6 + $0x64] ss:$8 sps:$4 sm:$0xff]   ;;  %v790_v4 = vld [vmem:[#allocation6 + $0x60] ss:$8 sps:$4 sm:$0xff]  }
  0x45   : > { %376 = vmatpush1.bf16.msra.mxu0 %v787_v2  ;;  %v791_v5 = vld [vmem:[#allocation6 + $0x54] ss:$8 sps:$4 sm:$0xff]   ;;  %v793_v6 = vld [vmem:[#allocation6 + $0x50] ss:$8 sps:$4 sm:$0xff]   ;;  %v794_v7 = vld [vmem:[#allocation6 + $0x44] ss:$8 sps:$4 sm:$0xff]  }
  0x46   : > { %377 = vmatprep.subr.bf16.mxu0 %v788_v3  ;;  %v796_v8 = vld [vmem:[#allocation6 + $0x40] ss:$8 sps:$4 sm:$0xff]   ;;  %v797_v9 = vld [vmem:[#allocation6 + $0x34] ss:$8 sps:$4 sm:$0xff]   ;;  %v799_v10 = vld [vmem:[#allocation6 + $0x30] ss:$8 sps:$4 sm:$0xff]  }
  0x47   : > { %v800_v11 = vld [vmem:[#allocation6 + $0x24] ss:$8 sps:$4 sm:$0xff]   ;;  %v802_v12 = vld [vmem:[#allocation6 + $0x20] ss:$8 sps:$4 sm:$0xff]   ;;  %v803_v13 = vld [vmem:[#allocation6 + $0x14] ss:$8 sps:$4 sm:$0xff]  }
  0x48   : > { %v805_v14 = vld [vmem:[#allocation6 + $0x10] ss:$8 sps:$4 sm:$0xff]   ;;  %v806_v15 = vld [vmem:[#allocation6 + $0x4] ss:$8 sps:$4 sm:$0xff]   ;;  %v808_v16 = vld [vmem:[#allocation6] ss:$8 sps:$4 sm:$0xff]  }
  0x49   : > { %378 = vmatpush1.bf16.msra.mxu0 %v790_v4  ;;  %v809_v17 = vld [vmem:[%s1143_s6] sm:$0xff]   ;;  %v452_v19 = vshrl.u32 %v451_v18, 7  ;;  %s258_s7 = scalar_lea.vmem [#allocation8], %s670_s27  ;;  %s698_s9 = sshll.u32 %s978_s18, 8 }
  0x4a   : > { %379 = vmatprep.subr.bf16.mxu0 %v791_v5  ;;  %v449_v21 = vld [vmem:[%s1261_s2] sm:$0x3]  ;;  %s516_s8 = sshll.u32 %s258_s7, 4  ;;  %s1168_s14 = scalar_lea.hbm %s1262_s3, %s698_s9  ;;  %s1161_s8 = int_to_ptr.vmem [resolvable:$true] %s516_s8 }
  0x4b   : > { %v453_v20 = vsub.s32 0, %v452_v19  ;;  %v457_v22 = vsub.s32 1, %v452_v19  ;;  %s498_s11 = scalar_lea.sflag [#allocation5], %s1139_s21  ;;  %s872_s29 = scalar_lea.vmem %s1161_s8, 256 }
  0x4c   : > { %p873_p1 = scmp.ne.s32.totalorder %s1161_s8, %s872_s29  ;;  %s995_s12 = smov [#allocation8]  }
  0x4d   : > { %380 = vmatpush1.bf16.msra.mxu0 %v793_v6  ;;  %v454_v23 = vrot.slane %v449_v21, %v453_v20  ;;  %v458_v24 = vrot.slane %v449_v21, %v457_v22  ;;  %s876_s22 = sshll.u32 %s995_s12, 4  ;;  %s877_s22 = int_to_ptr.vmem [resolvable:$false] %s876_s22 }
  0x4e   : > { %381 = vmatprep.subr.bf16.mxu0 %v794_v7  ;;  %p874_p8 = pnand %p873_p1, %p1111_p13  ;;  %s878_s30 = scalar_lea.vmem %s877_s22, 512 }
  0x4f   : > { %p879_p0 = scmp.lt.s32.totalorder %s1161_s8, %s877_s22  ;;  %p880_p2 = scmp.lt.s32.totalorder %s878_s30, %s872_s29 }
  0x50   : > { %p875_p10 = pneg %p874_p8 }
  0x51   : > { %382 = vmatpush1.bf16.msra.mxu0 %v796_v8  ;;  %p881_p3 = por %p880_p2, %p879_p0 }
  0x52   : > { %383 = vmatprep.subr.bf16.mxu0 %v797_v9 }
  0x53   : > { %p882_p5 = pnand %p881_p3, %p875_p10 }
  0x55   : > { %384 = vmatpush1.bf16.msra.mxu0 %v799_v10 }
  0x56   : > { %385 = vmatprep.subr.bf16.mxu0 %v800_v11 }
  0x59   : > { %386 = vmatpush1.bf16.msra.mxu0 %v802_v12 }
  0x5a   : > { %387 = vmatprep.subr.bf16.mxu0 %v803_v13 }
  0x5d   : > { %388 = vmatpush1.bf16.msra.mxu0 %v805_v14 }
  0x5e   : > { %389 = vmatprep.subr.bf16.mxu0 %v806_v15 }
  0x61   : > { %390 = vmatpush1.bf16.msra.mxu0 %v808_v16 }
  0x64   : > { %408 = vmatmul.mubr.bf16.vlgmr.msra.gmra.mxu0 %v809_v17 }
 0x124   : > { %v409_v25 = vpop.f32.mrf.mxu0 }
 0x125   : > { %v461_v26 = vadd.f32 %v454_v23, %v409_v25 }
 0x126   : > { %v411_v27 = vpop.f32.mrf.mxu0 }
 0x127   : > { %465 = vst [vmem:[%s258_s7] sm:$0xff] %v461_v26  ;;  %v462_v28 = vadd.f32 %v458_v24, %v411_v27 }
 0x128   : > { %v413_v29 = vpop.f32.mrf.mxu0 }
 0x129   : > { %v469_v30 = vmin.f32 %v462_v28, 20.0  ;;  %v463_v31 = vadd.f32 %v454_v23, %v413_v29 }
 0x12a   : > { %v415_v32 = vpop.f32.mrf.mxu0 }
 0x12b   : > { %v471_v33 = vmul.f32 1.442695, %v469_v30  ;;  %466 = vst [vmem:[%s258_s7 + $0x8] sm:$0xff] %v463_v31  ;;  %v1170_v34 = vadd.f32 %v458_v24, %v415_v32 }
 0x12c   : > { %885 = shalt.err (!%p882_p5)
}
 0x12d   : > { %s886_s1 = scalar_lea.hbm %s1168_s14, 256  ;;  %s890_s25 = scalar_lea.hbm %s1262_s3, 512 }
 0x12e   : > { %p887_p7 = scmp.ne.s32.totalorder %s1168_s14, %s886_s1  ;;  %p891_p9 = scmp.lt.s32.totalorder %s1168_s14, %s1262_s3 }
 0x12f   : > { %p892_p11 = scmp.lt.s32.totalorder %s890_s25, %s886_s1 }
 0x130   : > { %p888_p6 = pnand %p887_p7, %p1111_p13 }
 0x131   : > { %p893_p12 = por %p892_p11, %p891_p9 }
 0x132   : > { %p889_p4 = pneg %p888_p6 }
 0x134   : > { %p894_p1 = pnand %p893_p12, %p889_p4 }
 0x136   : > { %897 = shalt.err (!%p894_p1)
}
 0x137   : > { %s996_s10 = smov 128   ;;  %s997_s29 = smov 8   ;;  %810 = vpow2.f32 %v471_v33  ;;  %v470_v35 = vmin.f32 %v1170_v34, 20.0  ;;  %vm467_vm1 = vcmp.gt.f32.partialorder %v462_v28, 20.0  ;;  %vm468_vm3 = vcmp.gt.f32.partialorder %v1170_v34, 20.0 }
 0x138   : > { %706 = dma.vmem_to_hbm [thread:$0]  (%p1111_p13), %s1161_s8, 256, %s1168_s14, %s498_s11, %s996_s10, %s996_s10, %s997_s29  }
 0x139   : > { %v473_v36 = vmul.f32 1.442695, %v470_v35  ;;  %s265_s8 = scalar_lea.vmem [#allocation9], %s670_s27  ;;  %s1209_s12 = scalar_lea.hbm %s1263_s4, %s698_s9 }
 0x13a   : > { %s532_s14 = sshll.u32 %s265_s8, 4  ;;  %s503_s22 = scalar_lea.sflag [#allocation10], %s1139_s21  ;;  %s1201_s14 = int_to_ptr.vmem [resolvable:$true] %s532_s14 }
 0x13b   : > { %812 = vpow2.f32 %v473_v36  ;;  %s898_s30 = scalar_lea.vmem %s1201_s14, 256  ;;  %s998_s1 = smov [#allocation9]  }
 0x13c   : > { %p899_p8 = scmp.ne.s32.totalorder %s1201_s14, %s898_s30  ;;  %s902_s6 = sshll.u32 %s998_s1, 4  ;;  %s903_s6 = int_to_ptr.vmem [resolvable:$false] %s902_s6 }
 0x13d   : > { %s904_s23 = scalar_lea.vmem %s903_s6, 512  ;;  %p905_p2 = scmp.lt.s32.totalorder %s1201_s14, %s903_s6 }
 0x13e   : > { %p900_p10 = pnand %p899_p8, %p1111_p13  ;;  %p906_p3 = scmp.lt.s32.totalorder %s904_s23, %s898_s30 }
 0x140   : > { %p901_p0 = pneg %p900_p10  ;;  %p907_p5 = por %p906_p3, %p905_p2 }
 0x142   : > { %p908_p7 = pnand %p907_p5, %p901_p0 }
 0x144   : > { %v811_v37 = vpop.eup %810 }
 0x145   : > { %v475_v38 = vadd.f32 1.0, %v811_v37  ;;  %v478_v41 = vmul.f32 -0.5, %v811_v37  ;;  %v481_v44 = vand.u32 2147483647, %v811_v37 }
 0x147   : > { %814 = vlog2.f32 %v475_v38  ;;  %v479_v42 = vadd.f32 1.0, %v478_v41  ;;  %vm482_vm0 = vcmp.lt.f32.partialorder %v481_v44, 0.0004427343 }
 0x148   : > { %v813_v39 = vpop.eup %812 }
 0x149   : > { %v484_v40 = vadd.f32 1.0, %v813_v39  ;;  %v487_v43 = vmul.f32 -0.5, %v813_v39  ;;  %v480_v47 = vmul.f32 %v811_v37, %v479_v42  ;;  %v490_v49 = vand.u32 2147483647, %v813_v39 }
 0x14b   : > { %816 = vlog2.f32 %v484_v40  ;;  %v488_v48 = vadd.f32 1.0, %v487_v43  ;;  %vm491_vm2 = vcmp.lt.f32.partialorder %v490_v49, 0.0004427343 }
 0x14d   : > { %v489_v54 = vmul.f32 %v813_v39, %v488_v48 }
 0x154   : > { %v815_v45 = vpop.eup %814 }
 0x155   : > { %v477_v46 = vmul.f32 0.6931472, %v815_v45 }
 0x157   : > { %v483_v50 = vsel %vm482_vm0, %v480_v47, %v477_v46 }
 0x158   : > { %v817_v51 = vpop.eup %816  ;;  %v493_v52 = vsel %vm467_vm1, %v462_v28, %v483_v50 }
 0x159   : > { %495 = vst [vmem:[%s265_s8] sm:$0xff] %v493_v52  ;;  %v486_v53 = vmul.f32 0.6931472, %v817_v51 }
 0x15b   : > { %v492_v55 = vsel %vm491_vm2, %v489_v54, %v486_v53 }
 0x15c   : > { %v494_v56 = vsel %vm468_vm3, %v1170_v34, %v492_v55 }
 0x15d   : > { %496 = vst [vmem:[%s265_s8 + $0x8] sm:$0xff] %v494_v56 }
 0x15e   : > { %911 = shalt.err (!%p908_p7)
}
 0x15f   : > { %s912_s18 = scalar_lea.hbm %s1209_s12, 256  ;;  %s916_s25 = scalar_lea.hbm %s1263_s4, 512 }
 0x160   : > { %p913_p6 = scmp.ne.s32.totalorder %s1209_s12, %s912_s18  ;;  %p917_p11 = scmp.lt.s32.totalorder %s1209_s12, %s1263_s4 }
 0x161   : > { %p918_p12 = scmp.lt.s32.totalorder %s916_s25, %s912_s18 }
 0x162   : > { %p914_p4 = pnand %p913_p6, %p1111_p13 }
 0x163   : > { %p919_p1 = por %p918_p12, %p917_p11 }
 0x164   : > { %p915_p9 = pneg %p914_p4 }
 0x166   : > { %p920_p8 = pnand %p919_p1, %p915_p9 }
 0x168   : > { %923 = shalt.err (!%p920_p8)
}
 0x169   : > { %707 = dma.vmem_to_hbm [thread:$0]  (%p1111_p13), %s1201_s14, 256, %s1209_s12, %s503_s22, %s996_s10, %s996_s10, %s997_s29  }
 0x16a PF: > { %s547_s8 = sand.u32 1, %s966_s15   ;;  %p1277_p10 = scmp.ne.s32.totalorder %s1269_s26, 0 }
 0x16b   : > { %p1278_p0 = scmp.ge.s32.totalorder %s986_s20, 2  ;;  %s548_s27 = scalar_lea.sflag [#allocation5], %s547_s8 }
 0x16d   : > { %p719_p2 = pnand %p1278_p0, %p1277_p10 }
 0x16f   : > { %p720_p3 = pneg %p719_p2 }
 0x171   : > { %957 = dma.done.wait (%p720_p3), %s548_s27, 256  }
 0x172   : > { %959 = vsyncadd (%p720_p3), %s548_s27, 4294967040  ;;  %s557_s11 = scalar_lea.sflag [#allocation10], %s547_s8 }
 0x173   : > { %961 = dma.done.wait (%p720_p3), %s557_s11, 256  }
 0x174   : > { %963 = vsyncadd (%p720_p3), %s557_s11, 4294967040  ;;  %s25_s20 = sadd.s32 1, %s986_s20   ;;  %s1279_s15 = smov %s970_s16 }
 0x175   : > { %p22_p5 = scmp.ge.s32.totalorder %s25_s20, 4   ;;  %s1280_s16 = smov %s974_s17 }
 0x176   : > { %s1281_s17 = smov %s1120_s28  ;;  %s1282_s18 = smov %s982_s19 }
 0x177   : > { %s1283_s19 = smov %s1285_s5  ;;  %24 = sbr.rel (!%p22_p5) target bundleno = 11 (0xb), region = 111 }
 0x17c   :  { %562 = vsyncpa [#allocation4], 1 }
 0x17d   :  { %564 = vsyncpa [#allocation4 + $0x1], 1 }
 0x17e   :  { %565 = vsyncpa [#allocation7], 1 }
 0x17f   :  { %566 = vsyncpa [#allocation5], 1 }
 0x180   :  { %568 = vsyncpa [#allocation5 + $0x1], 1 }
 0x181   :  { %569 = vsyncpa [#allocation10], 1 }
 0x182   :  { %571 = vsyncpa [#allocation10 + $0x1], 1 }

</bundles_post_ra>
